<compile_context>
chip_gen: v7x
topology: tpu7x:2x2x1
jax: 0.10.0
libtpu: 0.0.40
codegen_flags: <defaults>
</compile_context>

<pallas_src>
import jax
import jax.numpy as jnp
from jax.experimental import pallas as pl
from jax.experimental.pallas import tpu as pltpu

HIDDEN = 64          # the module hard-codes 64-wide hidden layers (hidden_size arg unused)
LANE = 128
PACK_ROWS = 4 * HIDDEN  # [b1 | b2 | w3-column | b3] stacked along sublanes


def critic_kernel(x_ref, w1_ref, w2_ref, pack_ref, o_ref):
    # x arrives in natural (TB, S) f32 layout; one small XLU transpose puts the batch
    # on the 128-lane axis so matmuls see N = TB and the output store is lane-dense.
    x = x_ref[...].T.astype(w1_ref.dtype)                 # (S, TB) bf16

    # Packed resident parameters (single f32 column, sublane-sliced at lane 0).
    b1 = pack_ref[0 * HIDDEN:1 * HIDDEN, :]               # (64, 1)
    b2 = pack_ref[1 * HIDDEN:2 * HIDDEN, :]               # (64, 1)
    w3 = pack_ref[2 * HIDDEN:3 * HIDDEN, :]               # (64, 1)  fc3 weight as a column
    b3 = pack_ref[3 * HIDDEN:3 * HIDDEN + 1, :]           # (1, 1)

    # fc1 + ReLU : (64, S) @ (S, TB) -> (64, TB); f32 accumulate, f32 elementwise.
    h1 = jnp.dot(w1_ref[...], x, preferred_element_type=jnp.float32) + b1
    h1 = jnp.maximum(h1, 0.0).astype(w2_ref.dtype)

    # fc2 + ReLU : (64, 64) @ (64, TB) -> (64, TB); keep f32 afterwards (v5e VALU).
    h2 = jnp.dot(w2_ref[...], h1, preferred_element_type=jnp.float32) + b2
    h2 = jnp.maximum(h2, 0.0)

    # fc3: an M=1 matmul underfills the MXU -> VPU multiply + cross-sublane reduce.
    out = jnp.sum(h2 * w3, axis=0, keepdims=True) + b3    # (1, TB) f32
    o_ref[...] = out.astype(o_ref.dtype)


def _round_up(x, m):
    return (x + m - 1) // m * m


def _pick_tile(batch, tb_max=4096):
    """Batch tile: multiple of 128 lanes; >=2 grid steps on multi-tile batches (v7x)."""
    b128 = _round_up(max(batch, 1), LANE)
    if b128 <= LANE:
        return LANE
    half = _round_up(b128 // 2, LANE)          # at least 2 tiles -> both v7x TCs busy
    return max(LANE, min(half, _round_up(tb_max, LANE)))


def pack_params(params, compute_dtype=jnp.bfloat16):
    """One-time prep outside the hot path: bf16 weights + single packed f32 column."""
    w1 = jnp.asarray(params["w1"], compute_dtype)                 # (64, S)
    w2 = jnp.asarray(params["w2"], compute_dtype)                 # (64, 64)
    b1 = jnp.asarray(params["b1"], jnp.float32).reshape(-1)       # (64,)
    b2 = jnp.asarray(params["b2"], jnp.float32).reshape(-1)       # (64,)
    w3 = jnp.asarray(params["w3"], jnp.float32).reshape(-1)       # (64,)
    b3 = jnp.asarray(params["b3"], jnp.float32).reshape(-1)       # (1,)
    col = jnp.zeros((PACK_ROWS,), jnp.float32)
    col = col.at[0 * HIDDEN:1 * HIDDEN].set(b1)
    col = col.at[1 * HIDDEN:2 * HIDDEN].set(b2)
    col = col.at[2 * HIDDEN:3 * HIDDEN].set(w3)
    col = col.at[3 * HIDDEN].set(b3[0])
    return {"w1": w1, "w2": w2, "pack": col.reshape(PACK_ROWS, 1)}


@jax.jit
def critic_forward(x, packed):
    """x: (B, state_size) f32, natural layout. packed: output of pack_params()."""
    B, S = x.shape
    tb = _pick_tile(B)
    num_tiles = pl.cdiv(B, tb)
    b_pad = num_tiles * tb

    # Weights/biases are full-array blocks that stay VMEM-resident across grid steps.
    resident = lambda arr: pl.BlockSpec(arr.shape, lambda i: (0, 0))

    out = pl.pallas_call(
        critic_kernel,
        # Output padded to whole tiles -> every store is an unmasked lane-dense block.
        out_shape=jax.ShapeDtypeStruct((1, b_pad), jnp.float32),
        grid=(num_tiles,),
        in_specs=[
            # Pipelined activation tile, natural (B, S) layout (partial last block OK:
            # OOB rows read unspecified padding that only feeds padded output columns).
            pl.BlockSpec((tb, S), lambda i: (i, 0)),
            resident(packed["w1"]),
            resident(packed["w2"]),
            resident(packed["pack"]),
        ],
        out_specs=pl.BlockSpec((1, tb), lambda i: (0, i)),
        compiler_params=pltpu.CompilerParams(
            dimension_semantics=("parallel",),        # v7x: shard batch tiles across TCs
            vmem_limit_bytes=32 * 1024 * 1024,
        ),
    )(x, packed["w1"], packed["w2"], packed["pack"])

    # Padded batch columns hold garbage (computed from OOB input padding) — slice away.
    return out[:, :B].reshape(B, 1)


def init_params(key, state_size, hidden=HIDDEN):
    """Deterministic synthetic init (PyTorch-Linear-like uniform ranges), (out,in) layout."""
    def linear(key, fan_in, fan_out):
        kw, kb = jax.random.split(key)
        bound = 1.0 / jnp.sqrt(fan_in)
        w = jax.random.uniform(kw, (fan_out, fan_in), jnp.float32, -bound, bound)
        b = jax.random.uniform(kb, (fan_out, 1), jnp.float32, -bound, bound)
        return w, b

    k1, k2, k3 = jax.random.split(key, 3)
    w1, b1 = linear(k1, state_size, hidden)
    w2, b2 = linear(k2, hidden, hidden)
    w3, b3 = linear(k3, hidden, 1)
    return {"w1": w1, "b1": b1, "w2": w2, "b2": b2, "w3": w3, "b3": b3}


def critic_reference(x, p, compute_dtype=jnp.bfloat16):
    """Pure-JAX reference mirroring the kernel's dtype path (bf16 matmul operands for
    fc1/fc2, f32 accumulate, f32 fc3)."""
    q = lambda a: a.astype(compute_dtype).astype(jnp.float32)
    b1 = p["b1"].reshape(1, -1)
    b2 = p["b2"].reshape(1, -1)
    b3 = p["b3"].reshape(1, -1)
    h1 = jnp.maximum(q(x) @ q(p["w1"]).T + b1, 0.0)
    h2 = jnp.maximum(q(h1) @ q(p["w2"]).T + b2, 0.0)
    return h2 @ p["w3"].astype(jnp.float32).reshape(-1, 1) + b3     # (B, 1)


if __name__ == "__main__":
    key = jax.random.PRNGKey(0)
    k_x, k_p, k_x2 = jax.random.split(key, 3)

    batch, state_size = 8, 16
    x = jax.random.normal(k_x, (batch, state_size), jnp.float32)
    params = init_params(k_p, state_size)
    packed = pack_params(params)

    out = jax.block_until_ready(critic_forward(x, packed))
    ref = critic_reference(x, params)
    assert out.shape == (batch, 1), out.shape
    assert jnp.allclose(out, ref, atol=1e-2, rtol=1e-2), "mismatch vs reference (small batch)"

    # Multi-tile / ragged-batch path (grid > 1, partial final block).
    batch2 = 300
    x2 = jax.random.normal(k_x2, (batch2, state_size), jnp.float32)
    out2 = jax.block_until_ready(critic_forward(x2, packed))
    ref2 = critic_reference(x2, params)
    assert out2.shape == (batch2, 1), out2.shape
    assert jnp.allclose(out2, ref2, atol=1e-2, rtol=1e-2), "mismatch vs reference (ragged batch)"

    print("KERNEL_OK")
</pallas_src>

<mosaic_0001>
module attributes {stable_mosaic.version = 11 : i64} {
  func.func @critic_kernel(%arg0: i32, %arg1: memref<128x16xf32, #tpu.memory_space<vmem>>, %arg2: memref<64x16xbf16, #tpu.memory_space<vmem>>, %arg3: memref<64x64xbf16, #tpu.memory_space<vmem>>, %arg4: memref<256x1xf32, #tpu.memory_space<vmem>>, %arg5: memref<1x128xf32, #tpu.memory_space<vmem>>) attributes {dimension_semantics = [#tpu.dimension_semantics<parallel>], iteration_bounds = array<i64: 1>, scalar_prefetch = 0 : i64, scratch_operands = 0 : i64, tpu.core_type = #tpu.core_type<tc>, window_params = [{transform_indices = @transform_0, window_bounds = array<i64: 128, 16>}, {pipeline_mode = #tpu.pipeline_mode<synchronous>, transform_indices = @transform_1, window_bounds = array<i64: 64, 16>}, {pipeline_mode = #tpu.pipeline_mode<synchronous>, transform_indices = @transform_2, window_bounds = array<i64: 64, 64>}, {pipeline_mode = #tpu.pipeline_mode<synchronous>, transform_indices = @transform_3, window_bounds = array<i64: 256, 1>}, {transform_indices = @transform_4, window_bounds = array<i64: 1, 128>}]} {
    %c0 = arith.constant 0 : index
    %c0_0 = arith.constant 0 : index
    %0 = vector.load %arg1[%c0, %c0_0] : memref<128x16xf32, #tpu.memory_space<vmem>>, vector<128x16xf32>
    %1 = tpu.transpose %0, [1, 0] : vector<128x16xf32> -> vector<16x128xf32>
    %2 = arith.truncf %1 : vector<16x128xf32> to vector<16x128xbf16>
    %c0_1 = arith.constant 0 : index
    %c0_2 = arith.constant 0 : index
    %3 = vector.load %arg4[%c0_1, %c0_2] : memref<256x1xf32, #tpu.memory_space<vmem>>, vector<64x1xf32>
    %c64 = arith.constant 64 : index
    %c0_3 = arith.constant 0 : index
    %4 = vector.load %arg4[%c64, %c0_3] : memref<256x1xf32, #tpu.memory_space<vmem>>, vector<64x1xf32>
    %c128 = arith.constant 128 : index
    %c0_4 = arith.constant 0 : index
    %5 = vector.load %arg4[%c128, %c0_4] : memref<256x1xf32, #tpu.memory_space<vmem>>, vector<64x1xf32>
    %c192 = arith.constant 192 : index
    %c0_5 = arith.constant 0 : index
    %6 = vector.load %arg4[%c192, %c0_5] : memref<256x1xf32, #tpu.memory_space<vmem>>, vector<1x1xf32>
    %c0_6 = arith.constant 0 : index
    %c0_7 = arith.constant 0 : index
    %7 = vector.load %arg2[%c0_6, %c0_7] : memref<64x16xbf16, #tpu.memory_space<vmem>>, vector<64x16xbf16>
    %cst = arith.constant dense<0.000000e+00> : vector<64x128xf32>
    %8 = tpu.matmul %7, %2, %cst {dimension_numbers = #tpu.dot_dimension_numbers<[1], [0], [0], [1], [0, 0, 1, 1], [], []>} : vector<64x16xbf16>, vector<16x128xbf16>, vector<64x128xf32> -> vector<64x128xf32>
    %9 = vector.broadcast %3 : vector<64x1xf32> to vector<64x128xf32>
    %10 = arith.addf %8, %9 : vector<64x128xf32>
    %cst_8 = arith.constant 0.000000e+00 : f32
    %11 = vector.broadcast %cst_8 : f32 to vector<64x128xf32>
    %12 = arith.maximumf %10, %11 : vector<64x128xf32>
    %13 = arith.truncf %12 : vector<64x128xf32> to vector<64x128xbf16>
    %c0_9 = arith.constant 0 : index
    %c0_10 = arith.constant 0 : index
    %14 = vector.load %arg3[%c0_9, %c0_10] : memref<64x64xbf16, #tpu.memory_space<vmem>>, vector<64x64xbf16>
    %cst_11 = arith.constant dense<0.000000e+00> : vector<64x128xf32>
    %15 = tpu.matmul %14, %13, %cst_11 {dimension_numbers = #tpu.dot_dimension_numbers<[1], [0], [0], [1], [0, 0, 1, 1], [], []>} : vector<64x64xbf16>, vector<64x128xbf16>, vector<64x128xf32> -> vector<64x128xf32>
    %16 = vector.broadcast %4 : vector<64x1xf32> to vector<64x128xf32>
    %17 = arith.addf %15, %16 : vector<64x128xf32>
    %cst_12 = arith.constant 0.000000e+00 : f32
    %18 = vector.broadcast %cst_12 : f32 to vector<64x128xf32>
    %19 = arith.maximumf %17, %18 : vector<64x128xf32>
    %20 = vector.broadcast %5 : vector<64x1xf32> to vector<64x128xf32>
    %21 = arith.mulf %19, %20 : vector<64x128xf32>
    %cst_13 = arith.constant dense<0.000000e+00> : vector<128xf32>
    %22 = vector.multi_reduction <add>, %21, %cst_13 [0] : vector<64x128xf32> to vector<128xf32>
    %23 = vector.shape_cast %22 : vector<128xf32> to vector<1x128xf32>
    %24 = vector.broadcast %6 : vector<1x1xf32> to vector<1x128xf32>
    %25 = arith.addf %23, %24 : vector<1x128xf32>
    %c0_14 = arith.constant 0 : index
    %c0_15 = arith.constant 0 : index
    %26 = vector.load %arg5[%c0_14, %c0_15] : memref<1x128xf32, #tpu.memory_space<vmem>>, vector<1x128xf32>
    tpu.vector_store %arg5[%c0_14, %c0_15], %25 {strides = array<i32>} : memref<1x128xf32, #tpu.memory_space<vmem>>, vector<1x128xf32>,
    return
  }
  func.func @transform_0(%arg0: i32) -> (i32, i32) {
    %c0_i32 = arith.constant 0 : i32
    %c0_i32_0 = arith.constant 0 : i32
    return %arg0, %c0_i32 : i32, i32
  }
  func.func @transform_1(%arg0: i32) -> (i32, i32) {
    %c0_i32 = arith.constant 0 : i32
    %c0_i32_0 = arith.constant 0 : i32
    %c0_i32_1 = arith.constant 0 : i32
    return %c0_i32, %c0_i32_0 : i32, i32
  }
  func.func @transform_2(%arg0: i32) -> (i32, i32) {
    %c0_i32 = arith.constant 0 : i32
    %c0_i32_0 = arith.constant 0 : i32
    %c0_i32_1 = arith.constant 0 : i32
    return %c0_i32, %c0_i32_0 : i32, i32
  }
  func.func @transform_3(%arg0: i32) -> (i32, i32) {
    %c0_i32 = arith.constant 0 : i32
    %c0_i32_0 = arith.constant 0 : i32
    %c0_i32_1 = arith.constant 0 : i32
    return %c0_i32, %c0_i32_0 : i32, i32
  }
  func.func @transform_4(%arg0: i32) -> (i32, i32) {
    %c0_i32 = arith.constant 0 : i32
    %c0_i32_0 = arith.constant 0 : i32
    return %c0_i32, %arg0 : i32, i32
  }
}

</mosaic_0001>

<bundles_post_ra>
// kernel: critic_forward.1
= control target key start
LH: loop header
LB: loop body
LE: loop exit
PB: predicated region body
PF: predicated region fallthrough
CT: control target
= control target key end

     0   :  { %v550_v1 = vmov 0   ;;  %vm160_vm0 = vcmask 130048   ;;  %vm318_vm1 = vcmask 523264   ;;  %s736_s0 = inlined_call_operand.vmem [shape: f32[8,16], index: 0, kind: input, shape index: {}]   ;;  %s737_s3 = inlined_call_operand.vmem [shape: f32[256,1], index: 3, kind: input, shape index: {}]   ;;  %s738_s1 = inlined_call_operand.vmem [shape: bf16[64,16], index: 1, kind: input, shape index: {}]   ;;  %s739_s2 = inlined_call_operand.vmem [shape: bf16[64,64], index: 2, kind: input, shape index: {}]   ;;  %s740_s4 = inlined_call_operand.vmem [shape: f32[1,128], index: 4, kind: output, shape index: {}]  }
   0x1   :  { %v18_v0 = vld [vmem:[%s736_s0] sm:$0xff]  ;;  %540 = vset.pattern.permute.xlu1 %v550_v1  ;;  %v19_v2 = vld [vmem:[%s736_s0 + $0x8] sm:$0xff]  ;;  %v20_v4 = vld [vmem:[%s736_s0 + $0x10] sm:$0xff] }
   0x2   :  { %34 = vxpose.xlu0.b32.start [1/16] (narrow) %v18_v0, 16  ;;  %v67_v3 = vld [vmem:[%s737_s3] sm:$0xff]  ;;  %v68_v5 = vld [vmem:[%s737_s3 + $0x8] sm:$0xff]  ;;  %v21_v6 = vld [vmem:[%s736_s0 + $0x18] sm:$0xff] }
   0x3   :  { %102 = vperm.xlu1 %540, %v67_v3   ;;  %v542_v7 = vld [vmem:[%s738_s1] sm:$0xff]   ;;  %v69_v8 = vld [vmem:[%s737_s3 + $0x10] sm:$0xff]  ;;  %v70_v10 = vld [vmem:[%s737_s3 + $0x18] sm:$0xff] }
   0x4   :  { %507 = vmatprep.mubr.msk.bf16.mxu0 %vm160_vm0, %v542_v7  ;;  %v22_v9 = vld [vmem:[%s736_s0 + $0x20] sm:$0xff]  ;;  %v23_v11 = vld [vmem:[%s736_s0 + $0x28] sm:$0xff]  ;;  %v24_v13 = vld [vmem:[%s736_s0 + $0x30] sm:$0xff] }
   0x5   :  { %v71_v12 = vld [vmem:[%s737_s3 + $0x20] sm:$0xff]  ;;  %v72_v14 = vld [vmem:[%s737_s3 + $0x28] sm:$0xff]  ;;  %v25_v15 = vld [vmem:[%s736_s0 + $0x38] sm:$0xff] }
   0x6   :  { %35 = vxpose.xlu0.b32.cont [2/16] (narrow) %v19_v2, 16  ;;  %v73_v16 = vld [vmem:[%s737_s3 + $0x30] sm:$0xff]  ;;  %v26_v17 = vld [vmem:[%s736_s0 + $0x40] sm:$0xff]  ;;  %v74_v18 = vld [vmem:[%s737_s3 + $0x38] sm:$0xff] }
   0x7   :  { %107 = vperm.xlu1 %540, %v68_v5   ;;  %v27_v19 = vld [vmem:[%s736_s0 + $0x48] sm:$0xff]  ;;  %v75_v20 = vld [vmem:[%s737_s3 + $0x40] sm:$0xff]  ;;  %v28_v21 = vld [vmem:[%s736_s0 + $0x50] sm:$0xff] }
   0x8   :  { %v76_v22 = vld [vmem:[%s737_s3 + $0x48] sm:$0xff]  ;;  %v29_v23 = vld [vmem:[%s736_s0 + $0x58] sm:$0xff]  ;;  %v77_v24 = vld [vmem:[%s737_s3 + $0x50] sm:$0xff] }
   0x9   :  { %v30_v25 = vld [vmem:[%s736_s0 + $0x60] sm:$0xff]  ;;  %v78_v26 = vld [vmem:[%s737_s3 + $0x58] sm:$0xff]  ;;  %v31_v27 = vld [vmem:[%s736_s0 + $0x68] sm:$0xff] }
   0xa   :  { %36 = vxpose.xlu0.b32.cont [3/16] (narrow) %v20_v4, 16  ;;  %v83_v28 = vld [vmem:[%s737_s3 + $0x80] sm:$0xff]  ;;  %v32_v29 = vld [vmem:[%s736_s0 + $0x70] sm:$0xff]  ;;  %v84_v30 = vld [vmem:[%s737_s3 + $0x88] sm:$0xff] }
   0xb   :  { %112 = vperm.xlu1 %540, %v69_v8   ;;  %v33_v31 = vld [vmem:[%s736_s0 + $0x78] sm:$0xff]  ;;  %v79_v32 = vld [vmem:[%s737_s3 + $0x60] sm:$0xff]  ;;  %v85_v33 = vld [vmem:[%s737_s3 + $0x90] sm:$0xff] }
   0xc   :  { %v86_v34 = vld [vmem:[%s737_s3 + $0x98] sm:$0xff]  ;;  %v81_v35 = vld [vmem:[%s737_s3 + $0x70] sm:$0xff]  ;;  %v87_v36 = vld [vmem:[%s737_s3 + $0xa0] sm:$0xff] }
   0xd   :  { %v82_v37 = vld [vmem:[%s737_s3 + $0x78] sm:$0xff]  ;;  %v88_v38 = vld [vmem:[%s737_s3 + $0xa8] sm:$0xff]  ;;  %v89_v39 = vld [vmem:[%s737_s3 + $0xb0] sm:$0xff] }
   0xe   :  { %37 = vxpose.xlu0.b32.cont [4/16] (narrow) %v21_v6, 16  ;;  %v90_v40 = vld [vmem:[%s737_s3 + $0xb8] sm:$0xff]  ;;  %v91_v41 = vld [vmem:[%s737_s3 + $0xc0] sm:$0x1]  ;;  %v543_v45 = vld [vmem:[%s738_s1 + $0x8] sm:$0xff]  }
   0xf   :  { %117 = vperm.xlu1 %540, %v70_v10   ;;  %v544_v46 = vld [vmem:[%s738_s1 + $0x10] sm:$0xff]   ;;  %v545_v47 = vld [vmem:[%s738_s1 + $0x18] sm:$0xff]   ;;  %v546_v48 = vld [vmem:[%s739_s2] sm:$0xff]  }
  0x10   :  { %v547_v49 = vld [vmem:[%s739_s2 + $0x10] sm:$0xff]   ;;  %v80_v50 = vld [vmem:[%s737_s3 + $0x68] sm:$0xff] }
  0x11   :  { %527 = vmatprep.mubr.msk.bf16.mxu1 %vm318_vm1, %v547_v49 }
  0x12   :  { %38 = vxpose.xlu0.b32.cont [5/16] (narrow) %v22_v9, 16 }
  0x13   :  { %122 = vperm.xlu1 %540, %v71_v12  }
  0x16   :  { %39 = vxpose.xlu0.b32.cont [6/16] (narrow) %v23_v11, 16 }
  0x17   :  { %127 = vperm.xlu1 %540, %v72_v14  }
  0x1a   :  { %40 = vxpose.xlu0.b32.cont [7/16] (narrow) %v24_v13, 16 }
  0x1b   :  { %132 = vperm.xlu1 %540, %v73_v16  }
  0x1e   :  { %41 = vxpose.xlu0.b32.cont [8/16] (narrow) %v25_v15, 16 }
  0x1f   :  { %137 = vperm.xlu1 %540, %v74_v18  }
  0x22   :  { %42 = vxpose.xlu0.b32.cont [9/16] (narrow) %v26_v17, 16 }
  0x23   :  { %260 = vperm.xlu1 %540, %v75_v20  }
  0x26   :  { %43 = vxpose.xlu0.b32.cont [10/16] (narrow) %v27_v19, 16 }
  0x27   :  { %265 = vperm.xlu1 %540, %v76_v22  }
  0x2a   :  { %44 = vxpose.xlu0.b32.cont [11/16] (narrow) %v28_v21, 16 }
  0x2b   :  { %270 = vperm.xlu1 %540, %v77_v24   ;;  %v549_v24 = vld [vmem:[%s739_s2 + $0x18] sm:$0xff]  }
  0x2e   :  { %45 = vxpose.xlu0.b32.cont [12/16] (narrow) %v29_v23, 16  ;;  %v548_v23 = vld [vmem:[%s739_s2 + $0x8] sm:$0xff]  }
  0x2f   :  { %275 = vperm.xlu1 %540, %v78_v26  }
  0x32   :  { %46 = vxpose.xlu0.b32.cont [13/16] (narrow) %v30_v25, 16 }
  0x33   :  { %406 = vperm.xlu1 %540, %v83_v28  }
  0x36   :  { %47 = vxpose.xlu0.b32.cont [14/16] (narrow) %v31_v27, 16 }
  0x37   :  { %411 = vperm.xlu1 %540, %v84_v30  }
  0x3a   :  { %48 = vxpose.xlu0.b32.cont [15/16] (narrow) %v32_v29, 16 }
  0x3b   :  { %280 = vperm.xlu1 %540, %v79_v32  }
  0x3e   :  { %49 = vxpose.xlu0.b32.end [16/16] (narrow) %v33_v31, 16 }
  0x3f   :  { %416 = vperm.xlu1 %540, %v85_v33  }
  0x43   :  { %421 = vperm.xlu1 %540, %v86_v34  }
  0x47   :  { %290 = vperm.xlu1 %540, %v81_v35  }
  0x4b   :  { %426 = vperm.xlu1 %540, %v87_v36  }
  0x4f   :  { %295 = vperm.xlu1 %540, %v82_v37  }
  0x53   :  { %431 = vperm.xlu1 %540, %v88_v38  }
  0x57   :  { %436 = vperm.xlu1 %540, %v89_v39  }
  0x5b   :  { %441 = vperm.xlu1 %540, %v90_v40  }
  0x5f   :  { %467 = vperm.xlu1 %540, %v91_v41  }
  0x67   :  { %541 = vset.pattern.permute.xlu0 %v550_v1 }
  0x68   :  { %285 = vperm.xlu0 %541, %v80_v50  }
  0x82   :  { %v50_v42 = vpop.trf.xlu0  ;;  %v103_v51 = vpop.permute.xlu1 %102 }
  0x86   :  { %v51_v43 = vpop.trf.xlu0  ;;  %v108_v52 = vpop.permute.xlu1 %107 }
  0x87   :  { %v66_v44 = vpack.c.bf16 %v51_v43, %v50_v42 }
  0x89   :  { %505 = vmatprep.subr.bf16.mxu0 %v66_v44 }
  0x8a   :  { %506 = vmatpush3.bf16.msra.mxu0 %v66_v44  ;;  %v113_v53 = vpop.permute.xlu1 %112 }
  0x8d   :  { %508 = vmatmul.mubr.msk.bf16.vlgmr.msra.gmra.mrb[0].mxu0 %vm160_vm0, %v543_v45 }
  0x8e   :  { %511 = vmatprep.mubr.msk.bf16.mxu0 %vm160_vm0, %v544_v46  ;;  %v118_v54 = vpop.permute.xlu1 %117 }
  0x92   :  { %v123_v55 = vpop.permute.xlu1 %122 }
  0x95   :  { %512 = vmatmul.mubr.msk.bf16.gmra.mrb[4].mxu0 %vm160_vm0, %v545_v47 }
  0x96   :  { %523 = vmatprep.mubr.msk.bf16.mxu0 %vm318_vm1, %v546_v48  ;;  %v128_v56 = vpop.permute.xlu1 %127 }
  0x9a   :  { %v133_v0 = vpop.permute.xlu1 %132 }
  0x9e   :  { %v138_v11 = vpop.permute.xlu1 %137 }
  0xa2   :  { %v261_v25 = vpop.permute.xlu1 %260 }
  0xa6   :  { %v266_v26 = vpop.permute.xlu1 %265 }
  0xaa   :  { %v271_v27 = vpop.permute.xlu1 %270 }
  0xae   :  { %v276_v28 = vpop.permute.xlu1 %275 }
  0xb2   :  { %v407_v29 = vpop.permute.xlu1 %406 }
  0xb6   :  { %v412_v30 = vpop.permute.xlu1 %411 }
  0xba   :  { %v281_v31 = vpop.permute.xlu1 %280 }
  0xbe   :  { %v417_v32 = vpop.permute.xlu1 %416 }
  0xc2   :  { %v422_v33 = vpop.permute.xlu1 %421 }
  0xc6   :  { %v291_v34 = vpop.permute.xlu1 %290 }
  0xca   :  { %v427_v35 = vpop.permute.xlu1 %426 }
  0xce   :  { %v296_v36 = vpop.permute.xlu1 %295 }
  0xe7   :  { %v286_v50 = vpop.permute.xlu0 %285 }
 0x160   :  { %v509_v57 = vpop.f32.mrb[0].mxu0 }
 0x161   :  { %v216_v58 = vadd.f32 %v509_v57, %v113_v53  ;;  %v207_v59 = vpop.f32.mrb[1].mxu0 }
 0x162   :  { %v208_v60 = vadd.f32 %v207_v59, %v103_v51  ;;  %v510_v61 = vpop.f32.mrb[2].mxu0 }
 0x163   :  { %v219_v62 = vadd.f32 %v510_v61, %v118_v54  ;;  %v210_v63 = vpop.f32.mrb[3].mxu0  ;;  %v240_v2 = vmax.f32 %v216_v58, 0.0  ;;  %v432_v54 = vpop.permute.xlu1 %431 }
 0x164   :  { %v211_v1 = vadd.f32 %v210_v63, %v108_v52  ;;  %v238_v4 = vmax.f32 %v208_v60, 0.0 }
 0x165   :  { %v241_v3 = vmax.f32 %v219_v62, 0.0 }
 0x166   :  { %v239_v5 = vmax.f32 %v211_v1, 0.0 }
 0x167   :  { %v247_v6 = vpack.c.bf16 %v241_v3, %v240_v2  ;;  %v437_v3 = vpop.permute.xlu1 %436 }
 0x168   :  { %v246_v7 = vpack.c.bf16 %v239_v5, %v238_v4  ;;  %v513_v8 = vpop.f32.mrb[4].mxu0 }
 0x169   :  { %v232_v9 = vadd.f32 %v513_v8, %v133_v0  ;;  %v223_v10 = vpop.f32.mrb[5].mxu0 }
 0x16a   :  { %v224_v12 = vadd.f32 %v223_v10, %v123_v55  ;;  %v514_v13 = vpop.f32.mrb[6].mxu0  ;;  %515 = vmatprep.subr.bf16.mxu0 %v246_v7  ;;  %531 = vmatprep.subr.bf16.mxu1 %v246_v7 }
 0x16b   :  { %v235_v14 = vadd.f32 %v514_v13, %v138_v11  ;;  %v226_v15 = vpop.f32.mrb[7].mxu0  ;;  %516 = vmatpush3.bf16.msra.mxu0 %v246_v7  ;;  %535 = vmatpush3.bf16.msra.mxu1 %v246_v7  ;;  %v244_v17 = vmax.f32 %v232_v9, 0.0 }
 0x16c   :  { %v227_v16 = vadd.f32 %v226_v15, %v128_v56  ;;  %517 = vmatprep.subr.bf16.mxu0 %v247_v6  ;;  %532 = vmatprep.subr.bf16.mxu1 %v247_v6  ;;  %v242_v19 = vmax.f32 %v224_v12, 0.0  ;;  %v442_v12 = vpop.permute.xlu1 %441 }
 0x16d   :  { %v245_v18 = vmax.f32 %v235_v14, 0.0 }
 0x16e   :  { %v243_v20 = vmax.f32 %v227_v16, 0.0 }
 0x16f   :  { %v249_v21 = vpack.c.bf16 %v245_v18, %v244_v17  ;;  %518 = vmatpush3.bf16.msra.mxu0 %v247_v6  ;;  %536 = vmatpush3.bf16.msra.mxu1 %v247_v6 }
 0x170   :  { %v248_v22 = vpack.c.bf16 %v243_v20, %v242_v19 }
 0x172   :  { %519 = vmatprep.subr.bf16.mxu0 %v248_v22  ;;  %533 = vmatprep.subr.bf16.mxu1 %v248_v22 }
 0x173   :  { %520 = vmatpush3.bf16.msra.mxu0 %v248_v22  ;;  %537 = vmatpush3.bf16.msra.mxu1 %v248_v22  ;;  %v468_v22 = vpop.permute.xlu1 %467 }
 0x174   :  { %521 = vmatprep.subr.bf16.mxu0 %v249_v21  ;;  %534 = vmatprep.subr.bf16.mxu1 %v249_v21 }
 0x177   :  { %522 = vmatpush3.bf16.msra.mxu0 %v249_v21  ;;  %538 = vmatpush3.bf16.msra.mxu1 %v249_v21 }
 0x17a   :  { %524 = vmatmul.mubr.msk.bf16.vlgmr.msra.gmra.mrb[8].mxu0 %vm318_vm1, %v548_v23  ;;  %528 = vmatmul.mubr.msk.bf16.vlgmr.msra.gmra.mrb[0].mxu1 %vm318_vm1, %v549_v24 }
 0x24d   :  { %v525_v37 = vpop.f32.mrb[8].mxu0  ;;  %v529_v38 = vpop.f32.mrb[0].mxu1 }
 0x24e   :  { %v365_v39 = vpop.f32.mrb[9].mxu0  ;;  %v381_v40 = vpop.f32.mrb[1].mxu1  ;;  %v374_v41 = vadd.f32 %v525_v37, %v271_v27  ;;  %v390_v60 = vadd.f32 %v529_v38, %v291_v34 }
 0x24f   :  { %v366_v42 = vadd.f32 %v365_v39, %v261_v25  ;;  %v526_v43 = vpop.f32.mrb[10].mxu0  ;;  %v530_v44 = vpop.f32.mrb[2].mxu1  ;;  %v382_v52 = vadd.f32 %v381_v40, %v281_v31 }
 0x250   :  { %v368_v45 = vpop.f32.mrb[11].mxu0  ;;  %v384_v46 = vpop.f32.mrb[3].mxu1  ;;  %v377_v48 = vadd.f32 %v526_v43, %v276_v28  ;;  %v398_v51 = vmax.f32 %v374_v41, 0.0  ;;  %v393_v0 = vadd.f32 %v530_v44, %v296_v36  ;;  %v402_v4 = vmax.f32 %v390_v60, 0.0 }
 0x251   :  { %v396_v47 = vmax.f32 %v366_v42, 0.0  ;;  %v369_v49 = vadd.f32 %v368_v45, %v266_v26  ;;  %v385_v58 = vadd.f32 %v384_v46, %v286_v50  ;;  %v400_v61 = vmax.f32 %v382_v52, 0.0 }
 0x252   :  { %v399_v56 = vmax.f32 %v377_v48, 0.0  ;;  %v446_v59 = vmul.f32 %v417_v32, %v398_v51  ;;  %v403_v7 = vmax.f32 %v393_v0, 0.0  ;;  %v450_v10 = vmul.f32 %v437_v3, %v402_v4 }
 0x253   :  { %v397_v53 = vmax.f32 %v369_v49, 0.0  ;;  %v444_v55 = vmul.f32 %v407_v29, %v396_v47  ;;  %v401_v2 = vmax.f32 %v385_v58, 0.0  ;;  %v448_v5 = vmul.f32 %v427_v35, %v400_v61 }
 0x254   :  { %v447_v63 = vmul.f32 %v422_v33, %v399_v56  ;;  %v451_v13 = vmul.f32 %v442_v12, %v403_v7 }
 0x255   :  { %v445_v57 = vmul.f32 %v412_v30, %v397_v53  ;;  %v449_v9 = vmul.f32 %v432_v54, %v401_v2 }
 0x257   :  { %v452_v62 = vadd.f32 %v445_v57, %v444_v55 }
 0x259   :  { %v453_v1 = vadd.f32 %v452_v62, %v446_v59 }
 0x25b   :  { %v454_v6 = vadd.f32 %v453_v1, %v447_v63 }
 0x25d   :  { %v455_v8 = vadd.f32 %v454_v6, %v448_v5 }
 0x25f   :  { %v456_v11 = vadd.f32 %v455_v8, %v449_v9 }
 0x261   :  { %v457_v14 = vadd.f32 %v456_v11, %v450_v10 }
 0x263   :  { %v458_v15 = vadd.f32 %v457_v14, %v451_v13 }
 0x265   :  { %v459_v16 = vrot.slane %v458_v15, 4 }
 0x267   :  { %v460_v17 = vadd.f32 %v459_v16, %v458_v15 }
 0x269   :  { %v461_v18 = vrot.slane %v460_v17, 2 }
 0x26b   :  { %v462_v19 = vadd.f32 %v461_v18, %v460_v17 }
 0x26d   :  { %v463_v20 = vrot.slane %v462_v19, 1 }
 0x26f   :  { %v464_v21 = vadd.f32 %v463_v20, %v462_v19 }
 0x271   :  { %v470_v23 = vadd.f32 %v468_v22, %v464_v21 }
 0x273   :  { %471 = vst [vmem:[%s740_s4] sm:$0x1] %v470_v23 }

</bundles_post_ra>
